<compile_context>
chip_gen: v6e
topology: v6e:2x2x1
jax: 0.10.0
libtpu: 0.0.40
codegen_flags: <defaults>
</compile_context>

<pallas_src>
import functools

import jax
import jax.numpy as jnp
from jax.experimental import pallas as pl
from jax.experimental.pallas import tpu as pltpu


_LANES = 128
_SUBLANES = 8
_MIN_BLOCK_BYTES = 512 * 1024        # keep blocks near the HBM-roofline knee
_SPLIT_BYTES = 4 * 1024 * 1024       # arrays above this get >= 4 blocks
_FALLBACK_BLOCK_BYTES = 4 * 1024 * 1024
_FALLBACK_VMEM_LIMIT = 40 * 1024 * 1024


def _memory_plan():
    """Return (target_block_bytes, vmem_limit_bytes), generation-aware when possible."""
    block = _FALLBACK_BLOCK_BYTES
    vmem_limit = _FALLBACK_VMEM_LIMIT
    try:  # trace-time hardware query; guard against older APIs / missing attrs
        cap = int(getattr(pltpu.get_tpu_info(), "vmem_capacity_bytes"))
        if cap > 0:
            # Double-buffered in + out = 4 buffers per block -> keep the
            # footprint <= ~cap/2 (v7x: 64 MiB physical -> 8 MiB blocks).
            block = max(1 << 20, min(8 << 20, cap // 8))
            vmem_limit = min(max(6 * block, 24 << 20), (cap * 3) // 4)
    except Exception:
        pass
    return block, vmem_limit


def _loglu_kernel(x_ref, o_ref, *, eps: float):
    x = x_ref[...]
    # Transcendental in f32 regardless of storage dtype. Constants folded to a
    # single VALU sub feeding the EUP log: -log((1+eps) - x). For the default
    # eps=1e-12 the (1+eps) rounds to 1.0 in f32 -- identical to the reference
    # (1 - x) + eps, which also rounds eps away for x < 0.
    xf = x.astype(jnp.float32)
    neg_branch = -jnp.log((1.0 + eps) - xf)
    # NaN/inf produced for x >= 1+eps is discarded by the select (forward only).
    o_ref[...] = jnp.where(x < 0, neg_branch.astype(o_ref.dtype), x)


def loglu(x: jax.Array, epsilon: float = 1e-12, *, block_bytes: int | None = None) -> jax.Array:
    """Elementwise LogLU. Accepts any shape (e.g. NCHW); returns same shape/dtype."""
    orig_shape, orig_dtype = x.shape, x.dtype
    n = x.size
    if n == 0:
        return x

    itemsize = jnp.dtype(orig_dtype).itemsize
    # Sublane packing multiple: 8 (f32), 16 (bf16/f16), 32 (int8/fp8).
    sub = max(_SUBLANES, 32 // max(itemsize, 1))

    target_block_bytes, vmem_limit = _memory_plan()
    if block_bytes is not None:  # override (used by tests to force ragged blocks)
        target_block_bytes = max(int(block_bytes), sub * _LANES * itemsize)

    flat = x.reshape(-1)
    # Pad granule is only the 128-lane width: block_shape (not the array) must
    # obey the (sub, 128) rule, and Pallas masks the ragged final row-block.
    pad = (-n) % _LANES
    if pad:
        # TODO(synk): handle the <128-element tail without a full pad + slice
        # (extra HBM passes) for the rare n % 128 != 0 case.
        flat = jnp.pad(flat, (0, pad))
    rows = (n + pad) // _LANES
    x2d = flat.reshape(rows, _LANES)

    # --- byte-targeted row tile ------------------------------------------------
    row_bytes = _LANES * itemsize
    total_bytes = rows * row_bytes
    target_rows = max(sub, target_block_bytes // row_bytes)
    rows_tile = min(rows, target_rows)

    if total_bytes >= _SPLIT_BYTES:
        # Aim for >= 4 blocks (>= 2 per TensorCore on v7x: megacore sharding
        # plus per-core in/out DMA overlap) while keeping blocks >= ~512 KiB.
        min_rows = max(sub, (_MIN_BLOCK_BYTES // row_bytes) // sub * sub)
        quarter = -(-rows // 4)                # ceil(rows / 4)
        quarter = -(-quarter // sub) * sub     # align up to sublane multiple
        rows_tile = min(rows_tile, max(min_rows, quarter))

    if rows_tile < rows:
        # Non-full blocks must be sublane-aligned; ragged final block is masked.
        rows_tile = max(sub, (rows_tile // sub) * sub)
    # else: single block equal to the full array dim (legal for any row count).

    grid = (pl.cdiv(rows, rows_tile),)

    out2d = pl.pallas_call(
        functools.partial(_loglu_kernel, eps=float(epsilon)),
        out_shape=jax.ShapeDtypeStruct((rows, _LANES), orig_dtype),
        grid_spec=pltpu.PrefetchScalarGridSpec(
            num_scalar_prefetch=0,
            grid=grid,
            in_specs=[pl.BlockSpec((rows_tile, _LANES), lambda i: (i, 0))],
            out_specs=pl.BlockSpec((rows_tile, _LANES), lambda i: (i, 0)),
        ),
        compiler_params=pltpu.CompilerParams(
            # TODO(synk): if profiling shows a single-TC schedule on v7x,
            # switch to an explicit CORE_PARALLEL leading axis / pl.core_map.
            dimension_semantics=("parallel",),
            vmem_limit_bytes=vmem_limit,
        ),
        cost_estimate=pl.CostEstimate(
            flops=4 * n,
            transcendentals=n,
            bytes_accessed=2 * rows * _LANES * itemsize,
        ),
    )(x2d)

    out_flat = out2d.reshape(-1)
    if pad:
        out_flat = out_flat[:n]
    return out_flat.reshape(orig_shape)


def loglu_reference(x: jax.Array, epsilon: float = 1e-12) -> jax.Array:
    xf = x.astype(jnp.float32)
    return jnp.where(x < 0, (-jnp.log(1.0 - xf + epsilon)).astype(x.dtype), x)


if __name__ == "__main__":
    key = jax.random.PRNGKey(0)

    # 1) NCHW input, like a conv feature map (single lane-dense block).
    x = jax.random.normal(key, (2, 4, 16, 16), dtype=jnp.float32)
    out = jax.block_until_ready(loglu(x))
    ref = loglu_reference(x)
    assert out.shape == x.shape and out.dtype == x.dtype
    assert jnp.allclose(out, ref, atol=1e-6, rtol=1e-6), "mismatch vs reference (f32)"

    # 2) Non-multiple-of-128 size -> padded slow path.
    x2 = jax.random.normal(jax.random.PRNGKey(1), (3, 5, 7, 11), dtype=jnp.float32)
    out2 = jax.block_until_ready(loglu(x2))
    assert jnp.allclose(out2, loglu_reference(x2), atol=1e-6, rtol=1e-6), "mismatch (padded)"

    # 3) f32 ragged final row-block (21 rows, 8-row tiles -> masked 5-row tail).
    x3 = jax.random.normal(jax.random.PRNGKey(2), (21 * 128,), dtype=jnp.float32)
    out3 = jax.block_until_ready(loglu(x3, block_bytes=4096))
    assert jnp.allclose(out3, loglu_reference(x3), atol=1e-6, rtol=1e-6), "mismatch (ragged f32)"

    # 4) bf16 ragged final row-block (21 rows, 16-row tiles -> masked 5-row tail,
    #    not a multiple of the bf16 (16,128) native tile).
    x4 = jax.random.normal(jax.random.PRNGKey(3), (21 * 128,), dtype=jnp.bfloat16)
    out4 = jax.block_until_ready(loglu(x4, block_bytes=4096))
    assert out4.dtype == jnp.bfloat16
    assert jnp.allclose(out4.astype(jnp.float32),
                        loglu_reference(x4).astype(jnp.float32),
                        atol=1e-2, rtol=1e-2), "mismatch (ragged bf16)"

    print("KERNEL_OK")
</pallas_src>

<mosaic_0001>
module attributes {stable_mosaic.version = 11 : i64} {
  func.func @_loglu_kernel(%arg0: i32, %arg1: memref<16x128xf32, #tpu.memory_space<vmem>>, %arg2: memref<16x128xf32, #tpu.memory_space<vmem>>) attributes {dimension_semantics = [#tpu.dimension_semantics<parallel>], iteration_bounds = array<i64: 1>, scalar_prefetch = 0 : i64, scratch_operands = 0 : i64, tpu.core_type = #tpu.core_type<tc>, window_params = [{transform_indices = @transform_0, window_bounds = array<i64: 16, 128>}, {transform_indices = @transform_1, window_bounds = array<i64: 16, 128>}]} {
    %c0 = arith.constant 0 : index
    %c0_0 = arith.constant 0 : index
    %0 = vector.load %arg1[%c0, %c0_0] : memref<16x128xf32, #tpu.memory_space<vmem>>, vector<16x128xf32>
    %cst = arith.constant 1.000000e+00 : f32
    %1 = vector.broadcast %cst : f32 to vector<16x128xf32>
    %2 = arith.subf %1, %0 : vector<16x128xf32>
    %3 = math.log %2 : vector<16x128xf32>
    %cst_1 = arith.constant 0.000000e+00 : f32
    %4 = vector.broadcast %cst_1 : f32 to vector<16x128xf32>
    %5 = arith.subf %4, %3 : vector<16x128xf32>
    %cst_2 = arith.constant 0.000000e+00 : f32
    %6 = vector.broadcast %cst_2 : f32 to vector<16x128xf32>
    %7 = arith.cmpf olt, %0, %6 : vector<16x128xf32>
    %8 = arith.select %7, %5, %0 : vector<16x128xi1>, vector<16x128xf32>
    %c0_3 = arith.constant 0 : index
    %c0_4 = arith.constant 0 : index
    %9 = vector.load %arg2[%c0_3, %c0_4] : memref<16x128xf32, #tpu.memory_space<vmem>>, vector<16x128xf32>
    tpu.vector_store %arg2[%c0_3, %c0_4], %8 {strides = array<i32>} : memref<16x128xf32, #tpu.memory_space<vmem>>, vector<16x128xf32>,
    return
  }
  func.func @transform_0(%arg0: i32) -> (i32, i32) {
    %c0_i32 = arith.constant 0 : i32
    %c0_i32_0 = arith.constant 0 : i32
    return %arg0, %c0_i32 : i32, i32
  }
  func.func @transform_1(%arg0: i32) -> (i32, i32) {
    %c0_i32 = arith.constant 0 : i32
    %c0_i32_0 = arith.constant 0 : i32
    return %arg0, %c0_i32 : i32, i32
  }
}

</mosaic_0001>

<bundles_post_ra>
// kernel: tpu_custom_call.1
= control target key start
LH: loop header
LB: loop body
LE: loop exit
PB: predicated region body
PF: predicated region fallthrough
CT: control target
= control target key end

     0   :  { %6 = vsyncpa [#allocation3], 0  ;;  %s134_s0 = inlined_call_operand.hbm [shape: f32[16,128], index: 0, kind: input, shape index: {}]   ;;  %s135_s1 = inlined_call_operand.hbm [shape: f32[16,128], index: 1, kind: output, shape index: {}]  }
   0x1   :  { %7 = vsyncpa [#allocation4], 0  ;;  %s108_s6 = smov [#allocation2]  }
   0x2   :  { %s13_s7 = sshll.u32 %s108_s6, 4  ;;  %s14_s7 = int_to_ptr.vmem [resolvable:$true] %s13_s7 }
   0x3   :  { %s72_s8 = scalar_lea.vmem %s14_s7, 256  ;;  %p77_p1 = scmp.lt.s32.totalorder %s14_s7, %s14_s7 }
   0x4   :  { %p73_p0 = scmp.ne.s32.totalorder %s14_s7, %s72_s8  ;;  %p78_p2 = scmp.lt.s32.totalorder %s72_s8, %s72_s8 }
   0x6   :  { %p79_p3 = por %p78_p2, %p77_p1 }
   0x8   :  { %p80_p4 = pnand %p79_p3, %p73_p0 }
   0xa   :  { %83 = shalt.err (!%p80_p4)
}
   0xb   :  { %s109_s9 = smov 128   ;;  %s110_s10 = smov 8  }
   0xc   :  { %19 = dma.hbm_to_vmem [thread:$0]  %s134_s0, 256, %s14_s7, [#allocation3], %s109_s9, %s109_s9, %s110_s10  }
   0xd   :  { %104 = dma.done.wait [#allocation3], 256  }
   0xe   :  { %105 = vsyncadd [#allocation3], 4294967040  ;;  %v23_v0 = vld [vmem:[#allocation2] sm:$0xff]  ;;  %v24_v1 = vld [vmem:[#allocation2 + $0x8] sm:$0xff]  ;;  %s111_s13 = smov [#allocation5]  }
   0xf   :  { %v25_v2 = vsub.f32 1.0, %v23_v0  ;;  %v26_v3 = vsub.f32 1.0, %v24_v1  ;;  %vm33_vm0 = vcmp.lt.f32.partialorder %v23_v0, 0.0  ;;  %s44_s14 = sshll.u32 %s111_s13, 4  ;;  %vm34_vm1 = vcmp.lt.f32.partialorder %v24_v1, 0.0  ;;  %s45_s14 = int_to_ptr.vmem [resolvable:$true] %s44_s14 }
  0x10   :  { %s84_s0 = scalar_lea.vmem %s45_s14, 256  ;;  %p89_p6 = scmp.lt.s32.totalorder %s45_s14, %s45_s14 }
  0x11   :  { %60 = vlog2.f32 %v25_v2  ;;  %p85_p5 = scmp.ne.s32.totalorder %s45_s14, %s84_s0  ;;  %p90_p7 = scmp.lt.s32.totalorder %s84_s0, %s84_s0 }
  0x12   :  { %62 = vlog2.f32 %v26_v3 }
  0x13   :  { %p91_p8 = por %p90_p7, %p89_p6 }
  0x15   :  { %p92_p9 = pnand %p91_p8, %p85_p5 }
  0x1e   :  { %v61_v4 = vpop.eup %60 }
  0x1f   :  { %v63_v5 = vpop.eup %62  ;;  %v28_v6 = vmul.f32 0.6931472, %v61_v4 }
  0x20   :  { %v30_v7 = vmul.f32 0.6931472, %v63_v5 }
  0x21   :  { %v31_v8 = vsub.f32 0.0, %v28_v6 }
  0x22   :  { %v32_v9 = vsub.f32 0.0, %v30_v7 }
  0x23   :  { %v35_v10 = vsel %vm33_vm0, %v31_v8, %v23_v0 }
  0x24   :  { %37 = vst [vmem:[#allocation5] sm:$0xff] %v35_v10  ;;  %v36_v11 = vsel %vm34_vm1, %v32_v9, %v24_v1 }
  0x25   :  { %38 = vst [vmem:[#allocation5 + $0x8] sm:$0xff] %v36_v11 }
  0x26   :  { %95 = shalt.err (!%p92_p9)
}
  0x27   :  { %50 = dma.vmem_to_hbm [thread:$0]  %s45_s14, 256, %s135_s1, [#allocation4], %s109_s9, %s109_s9, %s110_s10  }
  0x28   :  { %106 = dma.done.wait [#allocation4], 256  }
  0x29   :  { %107 = vsyncadd [#allocation4], 4294967040 }
  0x2a   :  { %54 = vsyncpa [#allocation3], 1 }
  0x2b   :  { %55 = vsyncpa [#allocation4], 1 }

</bundles_post_ra>
